<compile_context>
chip_gen: v7x
topology: tpu7x:2x2x1
jax: 0.10.0
libtpu: 0.0.40
codegen_flags: <defaults>
</compile_context>

<pallas_src>
import jax
import jax.numpy as jnp
from jax import lax
from jax.experimental import pallas as pl
from jax.experimental.pallas import tpu as pltpu

# DBLoss hyper-parameters (the module has no learnable parameters).
ALPHA = 5.0
BETA = 10.0
OHEM_RATIO = 3
EPS = 1e-6

_OUT_ROWS = 8       # one (8, 128) f32 tile per sample
_OUT_LANES = 128

# lane indices of the 8 per-sample sums inside the output tile
_S_INTER, _S_PRED, _POS, _MASK, _L1_NUM, _L1_DEN, _B_INTER, _B_PRED = range(8)


def _db_sums_kernel(pred_ref, rh_ref, rwt_ref, rw_ref,
                    thr_map_ref, thr_mask_ref, shr_map_ref, shr_mask_ref,
                    out_ref, t1_ref, cvp_ref, cvm_ref):
    j = pl.program_id(1)
    last = pl.num_programs(1) - 1

    rh_tile = rh_ref[...]                                   # (TH, h) row-interp tile

    @pl.when(j == 0)
    def _init():
        out_ref[...] = jnp.zeros_like(out_ref)
        cvp_ref[...] = jnp.zeros_like(cvp_ref)
        cvm_ref[...] = jnp.zeros_like(cvm_ref)
        # Inner half of the threshold-channel interpolation, lane-dense (w -> W)
        # GEMM first; constant across row tiles of this sample, so stash it.
        t1_ref[...] = jnp.dot(pred_ref[0, 1], rwt_ref[...],
                              preferred_element_type=jnp.float32)       # (h, W)

    thr_map = thr_map_ref[0]                                # (TH, W)
    thr_mask = thr_mask_ref[0]
    shr_map = shr_map_ref[0]
    shr_mask = shr_mask_ref[0]

    vp = shr_map * shr_mask                                 # positive region, reused

    # Full-resolution bilinear interp of the threshold channel, this row tile only.
    pred_thr = jnp.dot(rh_tile, t1_ref[...],
                       preferred_element_type=jnp.float32)  # (TH, W), lane-dense

    l1_num_p = jnp.sum(jnp.abs(pred_thr - thr_map) * thr_mask)
    l1_den_p = jnp.sum(thr_mask)
    pos_p = jnp.sum(vp)
    msk_p = jnp.sum(shr_mask)

    # Linearity of interpolation: sum(interp(P) * M) == sum(P * (rh^T @ M @ rw)).
    # Accumulate the row contraction rh_tile^T @ M (K = TH, lane dim = W) per tile.
    rh_t = rh_tile.T                                        # (h, TH) tiny transpose
    cvp_ref[...] += jnp.dot(rh_t, vp, preferred_element_type=jnp.float32)        # (h, W)
    cvm_ref[...] += jnp.dot(rh_t, shr_mask, preferred_element_type=jnp.float32)  # (h, W)

    lane = lax.broadcasted_iota(jnp.int32, (1, _OUT_ROWS, _OUT_LANES), 2)

    def lane_pack(pairs):
        acc = jnp.zeros((1, _OUT_ROWS, _OUT_LANES), jnp.float32)
        for k, v in pairs:
            acc = acc + v * (lane == k).astype(jnp.float32)
        return acc

    out_ref[...] += lane_pack(
        [(_POS, pos_p), (_MASK, msk_p), (_L1_NUM, l1_num_p), (_L1_DEN, l1_den_p)])

    @pl.when(j == last)
    def _finalize():
        rw = rw_ref[...]                                                 # (W, w)
        cvp = jnp.dot(cvp_ref[...], rw, preferred_element_type=jnp.float32)   # (h, w)
        cvm = jnp.dot(cvm_ref[...], rw, preferred_element_type=jnp.float32)   # (h, w)
        p_shrink = pred_ref[0, 0]
        p_binary = pred_ref[0, 2]
        out_ref[...] += lane_pack([
            (_S_INTER, jnp.sum(p_shrink * cvp)),
            (_S_PRED, jnp.sum(p_shrink * cvm)),
            (_B_INTER, jnp.sum(p_binary * cvp)),
            (_B_PRED, jnp.sum(p_binary * cvm)),
        ])


def _interp_matrix(out_size, in_size):
    """Interpolation matrix matching F.interpolate(mode='bilinear', align_corners=True)."""
    if out_size == 1:
        src = jnp.zeros((1,), jnp.float32)
    else:
        src = jnp.arange(out_size, dtype=jnp.float32) * ((in_size - 1) / (out_size - 1))
    i0 = jnp.clip(jnp.floor(src).astype(jnp.int32), 0, in_size - 1)
    i1 = jnp.clip(i0 + 1, 0, in_size - 1)
    w1 = src - i0.astype(jnp.float32)
    w0 = 1.0 - w1
    m = (w0[:, None] * jax.nn.one_hot(i0, in_size, dtype=jnp.float32)
         + w1[:, None] * jax.nn.one_hot(i1, in_size, dtype=jnp.float32))
    return m.astype(jnp.float32)


def _pick_row_tile(H, max_rows=256):
    """Largest multiple-of-8 divisor of H that is <= min(max_rows, H // 2)."""
    limit = min(max_rows, max(8, H // 2))
    best = None
    for t in range(8, limit + 1, 8):
        if H % t == 0:
            best = t
    return best if best is not None else H


def _per_sample_sums(predicts, rh, rwt, rw, thr_map, thr_mask, shr_map, shr_mask):
    N, C, h, w = predicts.shape
    H, W = thr_map.shape[1], thr_map.shape[2]
    TH = _pick_row_tile(H)
    grid = (N, H // TH)

    map_spec = pl.BlockSpec((1, TH, W), lambda n, j: (n, j, 0))
    grid_spec = pltpu.PrefetchScalarGridSpec(
        num_scalar_prefetch=0,
        grid=grid,
        in_specs=[
            pl.BlockSpec((1, C, h, w), lambda n, j: (n, 0, 0, 0)),   # predicts (per sample)
            pl.BlockSpec((TH, h), lambda n, j: (j, 0)),              # rh row tile
            pl.BlockSpec((w, W), lambda n, j: (0, 0)),               # rw^T (lane-dense interp)
            pl.BlockSpec((W, w), lambda n, j: (0, 0)),               # rw (mask contraction)
            map_spec,                                                # threshold_map
            map_spec,                                                # threshold_mask
            map_spec,                                                # shrink_map
            map_spec,                                                # shrink_mask
        ],
        out_specs=pl.BlockSpec((1, _OUT_ROWS, _OUT_LANES), lambda n, j: (n, 0, 0)),
        scratch_shapes=[
            pltpu.VMEM((h, W), jnp.float32),   # threshold inner interp (per sample)
            pltpu.VMEM((h, W), jnp.float32),   # accumulated rh^T @ (shrink_map*shrink_mask)
            pltpu.VMEM((h, W), jnp.float32),   # accumulated rh^T @ shrink_mask
        ],
    )

    # VMEM limit sized from the actual (double-buffered) block + scratch footprint.
    itemsize = 4
    block_bytes = (C * h * w + TH * h + 2 * w * W + 4 * TH * W
                   + _OUT_ROWS * _OUT_LANES) * itemsize
    scratch_bytes = 3 * h * W * itemsize
    vmem_limit = min(max(2 * block_bytes + scratch_bytes + (8 << 20), 32 << 20), 100 << 20)

    return pl.pallas_call(
        _db_sums_kernel,
        out_shape=jax.ShapeDtypeStruct((N, _OUT_ROWS, _OUT_LANES), jnp.float32),
        grid_spec=grid_spec,
        compiler_params=pltpu.CompilerParams(
            dimension_semantics=("parallel", "arbitrary"),
            vmem_limit_bytes=vmem_limit),
    )(predicts, rh, rwt, rw, thr_map, thr_mask, shr_map, shr_mask)


def _combine(s_inter, s_pred, pos_sum, neg_sum, l1_num, l1_den, b_inter, b_pred,
             alpha, beta, ohem_ratio, eps):
    """BalanceLoss / MaskL1Loss / DiceLoss scalar math, vectorized over the batch."""
    dice_shrink = 1.0 - 2.0 * s_inter / (s_pred + pos_sum + eps)
    positive_count = jnp.floor(pos_sum)                       # int() truncation
    negative_count = jnp.floor(jnp.minimum(neg_sum, positive_count * ohem_ratio))
    positive_loss_sum = dice_shrink * pos_sum                 # (positive * scalar loss).sum()
    # OHEM hard-negative top-k: every candidate is either 0 or the scalar dice loss,
    # so the descending top-k sum is exactly negative_count copies of it.
    # TODO(synk): if predictions ever left [0,1] the dice scalar could go negative and
    # the true top-k would pick zeros instead; clamped here to cover that corner.
    topk_sum = jnp.maximum(dice_shrink, 0.0) * negative_count
    loss_shrink = jnp.where(
        negative_count > 0.0,
        (positive_loss_sum + topk_sum) / (positive_count + negative_count + eps),
        positive_loss_sum / (positive_count + eps))

    loss_threshold = l1_num / (l1_den + eps)                  # MaskL1Loss
    loss_binary = 1.0 - 2.0 * b_inter / (b_pred + pos_sum + eps)  # DiceLoss

    return jnp.sum(alpha * loss_shrink + beta * loss_threshold + loss_binary)


def db_loss(local_data, predicts, alpha=ALPHA, beta=BETA, ohem_ratio=OHEM_RATIO, eps=EPS):
    images = local_data['image']      # only (H, W) is used; never sent to the kernel
    thr_map = local_data['threshold_map'].astype(jnp.float32)
    thr_mask = local_data['threshold_mask'].astype(jnp.float32)
    shr_map = local_data['shrink_map'].astype(jnp.float32)
    shr_mask = local_data['shrink_mask'].astype(jnp.float32)

    H, W = images.shape[1], images.shape[2]
    h, w = predicts.shape[2], predicts.shape[3]

    rh = _interp_matrix(H, h)          # (H, h)
    rw = _interp_matrix(W, w)          # (W, w)
    rwt = rw.T                         # (w, W)

    sums = _per_sample_sums(predicts.astype(jnp.float32), rh, rwt, rw,
                            thr_map, thr_mask, shr_map, shr_mask)
    s = sums[:, 0, :]                  # (N, 128); first 8 lanes hold the sums
    return _combine(s[:, _S_INTER], s[:, _S_PRED], s[:, _POS],
                    s[:, _MASK] - s[:, _POS],
                    s[:, _L1_NUM], s[:, _L1_DEN], s[:, _B_INTER], s[:, _B_PRED],
                    alpha, beta, ohem_ratio, eps)


def _reference_loss(local_data, predicts, alpha=ALPHA, beta=BETA,
                    ohem_ratio=OHEM_RATIO, eps=EPS):
    """Pure-JAX (non-Pallas) mirror of db_loss, used only as a self-check."""
    H, W = local_data['image'].shape[1], local_data['image'].shape[2]
    h, w = predicts.shape[2], predicts.shape[3]
    rh = _interp_matrix(H, h)
    rw = _interp_matrix(W, w)
    pm = jnp.einsum('Hh,nchw,Ww->ncHW', rh, predicts.astype(jnp.float32), rw)
    shrink, thresh, binary = pm[:, 0], pm[:, 1], pm[:, 2]
    thr_map = local_data['threshold_map'].astype(jnp.float32)
    thr_mask = local_data['threshold_mask'].astype(jnp.float32)
    shr_map = local_data['shrink_map'].astype(jnp.float32)
    shr_mask = local_data['shrink_mask'].astype(jnp.float32)
    vp = shr_map * shr_mask
    ax = (1, 2)
    return _combine(jnp.sum(shrink * vp, axis=ax),
                    jnp.sum(shrink * shr_mask, axis=ax),
                    jnp.sum(vp, axis=ax),
                    jnp.sum(shr_mask, axis=ax) - jnp.sum(vp, axis=ax),
                    jnp.sum(jnp.abs(thresh - thr_map) * thr_mask, axis=ax),
                    jnp.sum(thr_mask, axis=ax),
                    jnp.sum(binary * vp, axis=ax),
                    jnp.sum(binary * shr_mask, axis=ax),
                    alpha, beta, ohem_ratio, eps)


if __name__ == "__main__":
    key = jax.random.PRNGKey(0)
    kp, ki, kt, ktm, ks, ksm = jax.random.split(key, 6)

    N, C, h, w = 2, 3, 8, 8      # prediction maps (N, 3, h, w) from the DB head
    H, W = 16, 16                # image / label resolution

    predicts = jax.random.uniform(kp, (N, C, h, w), dtype=jnp.float32)
    local_data = {
        'image': jax.random.uniform(ki, (N, H, W, 3), dtype=jnp.float32),
        'threshold_map': jax.random.uniform(kt, (N, H, W), dtype=jnp.float32),
        'threshold_mask': (jax.random.uniform(ktm, (N, H, W)) > 0.3).astype(jnp.float32),
        'shrink_map': (jax.random.uniform(ks, (N, H, W)) > 0.5).astype(jnp.float32),
        'shrink_mask': (jax.random.uniform(ksm, (N, H, W)) > 0.3).astype(jnp.float32),
    }

    loss = jax.jit(db_loss)(local_data, predicts)
    loss = jax.block_until_ready(loss)

    ref = jax.block_until_ready(_reference_loss(local_data, predicts))
    if not bool(jnp.allclose(loss, ref, rtol=1e-3, atol=1e-3)):
        raise SystemExit(f"kernel/reference mismatch: {float(loss)} vs {float(ref)}")

    print("KERNEL_OK")
</pallas_src>

<mosaic_0001>
module attributes {stable_mosaic.version = 11 : i64} {
  func.func @_db_sums_kernel(%arg0: i32, %arg1: i32, %arg2: memref<1x3x8x8xf32, #tpu.memory_space<vmem>>, %arg3: memref<8x8xf32, #tpu.memory_space<vmem>>, %arg4: memref<8x16xf32, #tpu.memory_space<vmem>>, %arg5: memref<16x8xf32, #tpu.memory_space<vmem>>, %arg6: memref<1x8x16xf32, #tpu.memory_space<vmem>>, %arg7: memref<1x8x16xf32, #tpu.memory_space<vmem>>, %arg8: memref<1x8x16xf32, #tpu.memory_space<vmem>>, %arg9: memref<1x8x16xf32, #tpu.memory_space<vmem>>, %arg10: memref<1x8x128xf32, #tpu.memory_space<vmem>>, %arg11: memref<8x16xf32, #tpu.memory_space<vmem>>, %arg12: memref<8x16xf32, #tpu.memory_space<vmem>>, %arg13: memref<8x16xf32, #tpu.memory_space<vmem>>) attributes {dimension_semantics = [#tpu.dimension_semantics<parallel>, #tpu.dimension_semantics<arbitrary>], iteration_bounds = array<i64: 2, 2>, scalar_prefetch = 0 : i64, scratch_operands = 3 : i64, tpu.core_type = #tpu.core_type<tc>, window_params = [{transform_indices = @transform_0, window_bounds = array<i64: 1, 3, 8, 8>}, {transform_indices = @transform_1, window_bounds = array<i64: 8, 8>}, {pipeline_mode = #tpu.pipeline_mode<synchronous>, transform_indices = @transform_2, window_bounds = array<i64: 8, 16>}, {pipeline_mode = #tpu.pipeline_mode<synchronous>, transform_indices = @transform_3, window_bounds = array<i64: 16, 8>}, {transform_indices = @transform_4, window_bounds = array<i64: 1, 8, 16>}, {transform_indices = @transform_5, window_bounds = array<i64: 1, 8, 16>}, {transform_indices = @transform_6, window_bounds = array<i64: 1, 8, 16>}, {transform_indices = @transform_7, window_bounds = array<i64: 1, 8, 16>}, {transform_indices = @transform_8, window_bounds = array<i64: 1, 8, 128>}]} {
    %c0 = arith.constant 0 : index
    %c0_0 = arith.constant 0 : index
    %0 = vector.load %arg3[%c0, %c0_0] : memref<8x8xf32, #tpu.memory_space<vmem>>, vector<8x8xf32>
    %c0_i32 = arith.constant 0 : i32
    %1 = arith.cmpi eq, %arg1, %c0_i32 : i32
    %2 = arith.extui %1 : i1 to i32
    %c0_i32_1 = arith.constant 0 : i32
    %3 = arith.cmpi ne, %2, %c0_i32_1 : i32
    scf.if %3 {
      %cst_38 = arith.constant 0.000000e+00 : f32
      %79 = vector.broadcast %cst_38 : f32 to vector<1x8x128xf32>
      %c0_39 = arith.constant 0 : index
      %c0_40 = arith.constant 0 : index
      %c0_41 = arith.constant 0 : index
      %80 = vector.load %arg10[%c0_39, %c0_40, %c0_41] : memref<1x8x128xf32, #tpu.memory_space<vmem>>, vector<1x8x128xf32>
      tpu.vector_store %arg10[%c0_39, %c0_40, %c0_41], %79 {strides = array<i32>} : memref<1x8x128xf32, #tpu.memory_space<vmem>>, vector<1x8x128xf32>,
      %cst_42 = arith.constant 0.000000e+00 : f32
      %81 = vector.broadcast %cst_42 : f32 to vector<8x16xf32>
      %c0_43 = arith.constant 0 : index
      %c0_44 = arith.constant 0 : index
      %82 = vector.load %arg12[%c0_43, %c0_44] : memref<8x16xf32, #tpu.memory_space<vmem>>, vector<8x16xf32>
      tpu.vector_store %arg12[%c0_43, %c0_44], %81 {strides = array<i32>} : memref<8x16xf32, #tpu.memory_space<vmem>>, vector<8x16xf32>,
      %cst_45 = arith.constant 0.000000e+00 : f32
      %83 = vector.broadcast %cst_45 : f32 to vector<8x16xf32>
      %c0_46 = arith.constant 0 : index
      %c0_47 = arith.constant 0 : index
      %84 = vector.load %arg13[%c0_46, %c0_47] : memref<8x16xf32, #tpu.memory_space<vmem>>, vector<8x16xf32>
      tpu.vector_store %arg13[%c0_46, %c0_47], %83 {strides = array<i32>} : memref<8x16xf32, #tpu.memory_space<vmem>>, vector<8x16xf32>,
      %c0_48 = arith.constant 0 : index
      %c1 = arith.constant 1 : index
      %c0_49 = arith.constant 0 : index
      %c0_50 = arith.constant 0 : index
      %85 = vector.load %arg2[%c0_48, %c1, %c0_49, %c0_50] : memref<1x3x8x8xf32, #tpu.memory_space<vmem>>, vector<1x1x8x8xf32>
      %86 = vector.shape_cast %85 : vector<1x1x8x8xf32> to vector<8x8xf32>
      %c0_51 = arith.constant 0 : index
      %c0_52 = arith.constant 0 : index
      %87 = vector.load %arg4[%c0_51, %c0_52] : memref<8x16xf32, #tpu.memory_space<vmem>>, vector<8x16xf32>
      %cst_53 = arith.constant dense<0.000000e+00> : vector<8x16xf32>
      %88 = tpu.matmul %86, %87, %cst_53 {dimension_numbers = #tpu.dot_dimension_numbers<[1], [0], [0], [1], [0, 0, 1, 1], [], []>} : vector<8x8xf32>, vector<8x16xf32>, vector<8x16xf32> -> vector<8x16xf32>
      %c0_54 = arith.constant 0 : index
      %c0_55 = arith.constant 0 : index
      %89 = vector.load %arg11[%c0_54, %c0_55] : memref<8x16xf32, #tpu.memory_space<vmem>>, vector<8x16xf32>
      tpu.vector_store %arg11[%c0_54, %c0_55], %88 {strides = array<i32>} : memref<8x16xf32, #tpu.memory_space<vmem>>, vector<8x16xf32>,
    } else {
    }
    %c0_2 = arith.constant 0 : index
    %c0_3 = arith.constant 0 : index
    %c0_4 = arith.constant 0 : index
    %4 = vector.load %arg6[%c0_2, %c0_3, %c0_4] : memref<1x8x16xf32, #tpu.memory_space<vmem>>, vector<1x8x16xf32>
    %5 = vector.shape_cast %4 : vector<1x8x16xf32> to vector<8x16xf32>
    %c0_5 = arith.constant 0 : index
    %c0_6 = arith.constant 0 : index
    %c0_7 = arith.constant 0 : index
    %6 = vector.load %arg7[%c0_5, %c0_6, %c0_7] : memref<1x8x16xf32, #tpu.memory_space<vmem>>, vector<1x8x16xf32>
    %7 = vector.shape_cast %6 : vector<1x8x16xf32> to vector<8x16xf32>
    %c0_8 = arith.constant 0 : index
    %c0_9 = arith.constant 0 : index
    %c0_10 = arith.constant 0 : index
    %8 = vector.load %arg8[%c0_8, %c0_9, %c0_10] : memref<1x8x16xf32, #tpu.memory_space<vmem>>, vector<1x8x16xf32>
    %9 = vector.shape_cast %8 : vector<1x8x16xf32> to vector<8x16xf32>
    %c0_11 = arith.constant 0 : index
    %c0_12 = arith.constant 0 : index
    %c0_13 = arith.constant 0 : index
    %10 = vector.load %arg9[%c0_11, %c0_12, %c0_13] : memref<1x8x16xf32, #tpu.memory_space<vmem>>, vector<1x8x16xf32>
    %11 = vector.shape_cast %10 : vector<1x8x16xf32> to vector<8x16xf32>
    %12 = arith.mulf %9, %11 : vector<8x16xf32>
    %c0_14 = arith.constant 0 : index
    %c0_15 = arith.constant 0 : index
    %13 = vector.load %arg11[%c0_14, %c0_15] : memref<8x16xf32, #tpu.memory_space<vmem>>, vector<8x16xf32>
    %cst = arith.constant dense<0.000000e+00> : vector<8x16xf32>
    %14 = tpu.matmul %0, %13, %cst {dimension_numbers = #tpu.dot_dimension_numbers<[1], [0], [0], [1], [0, 0, 1, 1], [], []>} : vector<8x8xf32>, vector<8x16xf32>, vector<8x16xf32> -> vector<8x16xf32>
    %15 = arith.subf %14, %5 : vector<8x16xf32>
    %16 = math.absf %15 : vector<8x16xf32>
    %17 = arith.mulf %16, %7 : vector<8x16xf32>
    %18 = vector.shape_cast %17 : vector<8x16xf32> to vector<1x8x16xf32>
    %cst_16 = arith.constant dense<0.000000e+00> : vector<1xf32>
    %19 = vector.multi_reduction <add>, %18, %cst_16 [1, 2] : vector<1x8x16xf32> to vector<1xf32>
    %20 = vector.shape_cast %19 : vector<1xf32> to vector<1x1x1xf32>
    %21 = vector.extract %20[0, 0, 0] : f32 from vector<1x1x1xf32>
    %22 = vector.shape_cast %7 : vector<8x16xf32> to vector<1x8x16xf32>
    %cst_17 = arith.constant dense<0.000000e+00> : vector<1xf32>
    %23 = vector.multi_reduction <add>, %22, %cst_17 [1, 2] : vector<1x8x16xf32> to vector<1xf32>
    %24 = vector.shape_cast %23 : vector<1xf32> to vector<1x1x1xf32>
    %25 = vector.extract %24[0, 0, 0] : f32 from vector<1x1x1xf32>
    %26 = vector.shape_cast %12 : vector<8x16xf32> to vector<1x8x16xf32>
    %cst_18 = arith.constant dense<0.000000e+00> : vector<1xf32>
    %27 = vector.multi_reduction <add>, %26, %cst_18 [1, 2] : vector<1x8x16xf32> to vector<1xf32>
    %28 = vector.shape_cast %27 : vector<1xf32> to vector<1x1x1xf32>
    %29 = vector.extract %28[0, 0, 0] : f32 from vector<1x1x1xf32>
    %30 = vector.shape_cast %11 : vector<8x16xf32> to vector<1x8x16xf32>
    %cst_19 = arith.constant dense<0.000000e+00> : vector<1xf32>
    %31 = vector.multi_reduction <add>, %30, %cst_19 [1, 2] : vector<1x8x16xf32> to vector<1xf32>
    %32 = vector.shape_cast %31 : vector<1xf32> to vector<1x1x1xf32>
    %33 = vector.extract %32[0, 0, 0] : f32 from vector<1x1x1xf32>
    %34 = tpu.transpose %0, [1, 0] : vector<8x8xf32> -> vector<8x8xf32>
    %c0_20 = arith.constant 0 : index
    %c0_21 = arith.constant 0 : index
    %35 = vector.load %arg12[%c0_20, %c0_21] : memref<8x16xf32, #tpu.memory_space<vmem>>, vector<8x16xf32>
    %cst_22 = arith.constant dense<0.000000e+00> : vector<8x16xf32>
    %36 = tpu.matmul %34, %12, %cst_22 {dimension_numbers = #tpu.dot_dimension_numbers<[1], [0], [0], [1], [0, 0, 1, 1], [], []>} : vector<8x8xf32>, vector<8x16xf32>, vector<8x16xf32> -> vector<8x16xf32>
    %37 = arith.addf %35, %36 : vector<8x16xf32>
    %c0_23 = arith.constant 0 : index
    %c0_24 = arith.constant 0 : index
    %38 = vector.load %arg12[%c0_23, %c0_24] : memref<8x16xf32, #tpu.memory_space<vmem>>, vector<8x16xf32>
    tpu.vector_store %arg12[%c0_23, %c0_24], %37 {strides = array<i32>} : memref<8x16xf32, #tpu.memory_space<vmem>>, vector<8x16xf32>,
    %c0_25 = arith.constant 0 : index
    %c0_26 = arith.constant 0 : index
    %39 = vector.load %arg13[%c0_25, %c0_26] : memref<8x16xf32, #tpu.memory_space<vmem>>, vector<8x16xf32>
    %cst_27 = arith.constant dense<0.000000e+00> : vector<8x16xf32>
    %40 = tpu.matmul %34, %11, %cst_27 {dimension_numbers = #tpu.dot_dimension_numbers<[1], [0], [0], [1], [0, 0, 1, 1], [], []>} : vector<8x8xf32>, vector<8x16xf32>, vector<8x16xf32> -> vector<8x16xf32>
    %41 = arith.addf %39, %40 : vector<8x16xf32>
    %c0_28 = arith.constant 0 : index
    %c0_29 = arith.constant 0 : index
    %42 = vector.load %arg13[%c0_28, %c0_29] : memref<8x16xf32, #tpu.memory_space<vmem>>, vector<8x16xf32>
    tpu.vector_store %arg13[%c0_28, %c0_29], %41 {strides = array<i32>} : memref<8x16xf32, #tpu.memory_space<vmem>>, vector<8x16xf32>,
    %43 = tpu.iota {dimensions = array<i32: 2>} : vector<1x8x128xi32>
    %c0_30 = arith.constant 0 : index
    %c0_31 = arith.constant 0 : index
    %c0_32 = arith.constant 0 : index
    %44 = vector.load %arg10[%c0_30, %c0_31, %c0_32] : memref<1x8x128xf32, #tpu.memory_space<vmem>>, vector<1x8x128xf32>
    %cst_33 = arith.constant 0.000000e+00 : f32
    %45 = vector.broadcast %cst_33 : f32 to vector<1x8x128xf32>
    %c2_i32 = arith.constant 2 : i32
    %46 = vector.broadcast %c2_i32 : i32 to vector<1x8x128xi32>
    %47 = arith.cmpi eq, %43, %46 : vector<1x8x128xi32>
    %48 = arith.extui %47 : vector<1x8x128xi1> to vector<1x8x128xi32>
    %49 = arith.sitofp %48 : vector<1x8x128xi32> to vector<1x8x128xf32>
    %50 = vector.broadcast %29 : f32 to vector<1x8x128xf32>
    %51 = arith.mulf %50, %49 : vector<1x8x128xf32>
    %52 = arith.addf %45, %51 : vector<1x8x128xf32>
    %c3_i32 = arith.constant 3 : i32
    %53 = vector.broadcast %c3_i32 : i32 to vector<1x8x128xi32>
    %54 = arith.cmpi eq, %43, %53 : vector<1x8x128xi32>
    %55 = arith.extui %54 : vector<1x8x128xi1> to vector<1x8x128xi32>
    %56 = arith.sitofp %55 : vector<1x8x128xi32> to vector<1x8x128xf32>
    %57 = vector.broadcast %33 : f32 to vector<1x8x128xf32>
    %58 = arith.mulf %57, %56 : vector<1x8x128xf32>
    %59 = arith.addf %52, %58 : vector<1x8x128xf32>
    %c4_i32 = arith.constant 4 : i32
    %60 = vector.broadcast %c4_i32 : i32 to vector<1x8x128xi32>
    %61 = arith.cmpi eq, %43, %60 : vector<1x8x128xi32>
    %62 = arith.extui %61 : vector<1x8x128xi1> to vector<1x8x128xi32>
    %63 = arith.sitofp %62 : vector<1x8x128xi32> to vector<1x8x128xf32>
    %64 = vector.broadcast %21 : f32 to vector<1x8x128xf32>
    %65 = arith.mulf %64, %63 : vector<1x8x128xf32>
    %66 = arith.addf %59, %65 : vector<1x8x128xf32>
    %c5_i32 = arith.constant 5 : i32
    %67 = vector.broadcast %c5_i32 : i32 to vector<1x8x128xi32>
    %68 = arith.cmpi eq, %43, %67 : vector<1x8x128xi32>
    %69 = arith.extui %68 : vector<1x8x128xi1> to vector<1x8x128xi32>
    %70 = arith.sitofp %69 : vector<1x8x128xi32> to vector<1x8x128xf32>
    %71 = vector.broadcast %25 : f32 to vector<1x8x128xf32>
    %72 = arith.mulf %71, %70 : vector<1x8x128xf32>
    %73 = arith.addf %66, %72 : vector<1x8x128xf32>
    %74 = arith.addf %44, %73 : vector<1x8x128xf32>
    %c0_34 = arith.constant 0 : index
    %c0_35 = arith.constant 0 : index
    %c0_36 = arith.constant 0 : index
    %75 = vector.load %arg10[%c0_34, %c0_35, %c0_36] : memref<1x8x128xf32, #tpu.memory_space<vmem>>, vector<1x8x128xf32>
    tpu.vector_store %arg10[%c0_34, %c0_35, %c0_36], %74 {strides = array<i32>} : memref<1x8x128xf32, #tpu.memory_space<vmem>>, vector<1x8x128xf32>,
    %c1_i32 = arith.constant 1 : i32
    %76 = arith.cmpi eq, %arg1, %c1_i32 : i32
    %77 = arith.extui %76 : i1 to i32
    %c0_i32_37 = arith.constant 0 : i32
    %78 = arith.cmpi ne, %77, %c0_i32_37 : i32
    scf.if %78 {
      %c0_38 = arith.constant 0 : index
      %c0_39 = arith.constant 0 : index
      %79 = vector.load %arg5[%c0_38, %c0_39] : memref<16x8xf32, #tpu.memory_space<vmem>>, vector<16x8xf32>
      %c0_40 = arith.constant 0 : index
      %c0_41 = arith.constant 0 : index
      %80 = vector.load %arg12[%c0_40, %c0_41] : memref<8x16xf32, #tpu.memory_space<vmem>>, vector<8x16xf32>
      %cst_42 = arith.constant dense<0.000000e+00> : vector<8x8xf32>
      %81 = tpu.matmul %80, %79, %cst_42 {dimension_numbers = #tpu.dot_dimension_numbers<[1], [0], [0], [1], [0, 0, 1, 1], [], []>} : vector<8x16xf32>, vector<16x8xf32>, vector<8x8xf32> -> vector<8x8xf32>
      %c0_43 = arith.constant 0 : index
      %c0_44 = arith.constant 0 : index
      %82 = vector.load %arg13[%c0_43, %c0_44] : memref<8x16xf32, #tpu.memory_space<vmem>>, vector<8x16xf32>
      %cst_45 = arith.constant dense<0.000000e+00> : vector<8x8xf32>
      %83 = tpu.matmul %82, %79, %cst_45 {dimension_numbers = #tpu.dot_dimension_numbers<[1], [0], [0], [1], [0, 0, 1, 1], [], []>} : vector<8x16xf32>, vector<16x8xf32>, vector<8x8xf32> -> vector<8x8xf32>
      %c0_46 = arith.constant 0 : index
      %c0_47 = arith.constant 0 : index
      %c0_48 = arith.constant 0 : index
      %c0_49 = arith.constant 0 : index
      %84 = vector.load %arg2[%c0_46, %c0_47, %c0_48, %c0_49] : memref<1x3x8x8xf32, #tpu.memory_space<vmem>>, vector<1x1x8x8xf32>
      %85 = vector.shape_cast %84 : vector<1x1x8x8xf32> to vector<8x8xf32>
      %c0_50 = arith.constant 0 : index
      %c2 = arith.constant 2 : index
      %c0_51 = arith.constant 0 : index
      %c0_52 = arith.constant 0 : index
      %86 = vector.load %arg2[%c0_50, %c2, %c0_51, %c0_52] : memref<1x3x8x8xf32, #tpu.memory_space<vmem>>, vector<1x1x8x8xf32>
      %87 = vector.shape_cast %86 : vector<1x1x8x8xf32> to vector<8x8xf32>
      %c0_53 = arith.constant 0 : index
      %c0_54 = arith.constant 0 : index
      %c0_55 = arith.constant 0 : index
      %88 = vector.load %arg10[%c0_53, %c0_54, %c0_55] : memref<1x8x128xf32, #tpu.memory_space<vmem>>, vector<1x8x128xf32>
      %89 = arith.mulf %85, %81 : vector<8x8xf32>
      %90 = vector.shape_cast %89 : vector<8x8xf32> to vector<1x8x8xf32>
      %cst_56 = arith.constant dense<0.000000e+00> : vector<1xf32>
      %91 = vector.multi_reduction <add>, %90, %cst_56 [1, 2] : vector<1x8x8xf32> to vector<1xf32>
      %92 = vector.shape_cast %91 : vector<1xf32> to vector<1x1x1xf32>
      %93 = vector.extract %92[0, 0, 0] : f32 from vector<1x1x1xf32>
      %94 = arith.mulf %85, %83 : vector<8x8xf32>
      %95 = vector.shape_cast %94 : vector<8x8xf32> to vector<1x8x8xf32>
      %cst_57 = arith.constant dense<0.000000e+00> : vector<1xf32>
      %96 = vector.multi_reduction <add>, %95, %cst_57 [1, 2] : vector<1x8x8xf32> to vector<1xf32>
      %97 = vector.shape_cast %96 : vector<1xf32> to vector<1x1x1xf32>
      %98 = vector.extract %97[0, 0, 0] : f32 from vector<1x1x1xf32>
      %99 = arith.mulf %87, %81 : vector<8x8xf32>
      %100 = vector.shape_cast %99 : vector<8x8xf32> to vector<1x8x8xf32>
      %cst_58 = arith.constant dense<0.000000e+00> : vector<1xf32>
      %101 = vector.multi_reduction <add>, %100, %cst_58 [1, 2] : vector<1x8x8xf32> to vector<1xf32>
      %102 = vector.shape_cast %101 : vector<1xf32> to vector<1x1x1xf32>
      %103 = vector.extract %102[0, 0, 0] : f32 from vector<1x1x1xf32>
      %104 = arith.mulf %87, %83 : vector<8x8xf32>
      %105 = vector.shape_cast %104 : vector<8x8xf32> to vector<1x8x8xf32>
      %cst_59 = arith.constant dense<0.000000e+00> : vector<1xf32>
      %106 = vector.multi_reduction <add>, %105, %cst_59 [1, 2] : vector<1x8x8xf32> to vector<1xf32>
      %107 = vector.shape_cast %106 : vector<1xf32> to vector<1x1x1xf32>
      %108 = vector.extract %107[0, 0, 0] : f32 from vector<1x1x1xf32>
      %cst_60 = arith.constant 0.000000e+00 : f32
      %109 = vector.broadcast %cst_60 : f32 to vector<1x8x128xf32>
      %c0_i32_61 = arith.constant 0 : i32
      %110 = vector.broadcast %c0_i32_61 : i32 to vector<1x8x128xi32>
      %111 = arith.cmpi eq, %43, %110 : vector<1x8x128xi32>
      %112 = arith.extui %111 : vector<1x8x128xi1> to vector<1x8x128xi32>
      %113 = arith.sitofp %112 : vector<1x8x128xi32> to vector<1x8x128xf32>
      %114 = vector.broadcast %93 : f32 to vector<1x8x128xf32>
      %115 = arith.mulf %114, %113 : vector<1x8x128xf32>
      %116 = arith.addf %109, %115 : vector<1x8x128xf32>
      %c1_i32_62 = arith.constant 1 : i32
      %117 = vector.broadcast %c1_i32_62 : i32 to vector<1x8x128xi32>
      %118 = arith.cmpi eq, %43, %117 : vector<1x8x128xi32>
      %119 = arith.extui %118 : vector<1x8x128xi1> to vector<1x8x128xi32>
      %120 = arith.sitofp %119 : vector<1x8x128xi32> to vector<1x8x128xf32>
      %121 = vector.broadcast %98 : f32 to vector<1x8x128xf32>
      %122 = arith.mulf %121, %120 : vector<1x8x128xf32>
      %123 = arith.addf %116, %122 : vector<1x8x128xf32>
      %c6_i32 = arith.constant 6 : i32
      %124 = vector.broadcast %c6_i32 : i32 to vector<1x8x128xi32>
      %125 = arith.cmpi eq, %43, %124 : vector<1x8x128xi32>
      %126 = arith.extui %125 : vector<1x8x128xi1> to vector<1x8x128xi32>
      %127 = arith.sitofp %126 : vector<1x8x128xi32> to vector<1x8x128xf32>
      %128 = vector.broadcast %103 : f32 to vector<1x8x128xf32>
      %129 = arith.mulf %128, %127 : vector<1x8x128xf32>
      %130 = arith.addf %123, %129 : vector<1x8x128xf32>
      %c7_i32 = arith.constant 7 : i32
      %131 = vector.broadcast %c7_i32 : i32 to vector<1x8x128xi32>
      %132 = arith.cmpi eq, %43, %131 : vector<1x8x128xi32>
      %133 = arith.extui %132 : vector<1x8x128xi1> to vector<1x8x128xi32>
      %134 = arith.sitofp %133 : vector<1x8x128xi32> to vector<1x8x128xf32>
      %135 = vector.broadcast %108 : f32 to vector<1x8x128xf32>
      %136 = arith.mulf %135, %134 : vector<1x8x128xf32>
      %137 = arith.addf %130, %136 : vector<1x8x128xf32>
      %138 = arith.addf %88, %137 : vector<1x8x128xf32>
      %c0_63 = arith.constant 0 : index
      %c0_64 = arith.constant 0 : index
      %c0_65 = arith.constant 0 : index
      %139 = vector.load %arg10[%c0_63, %c0_64, %c0_65] : memref<1x8x128xf32, #tpu.memory_space<vmem>>, vector<1x8x128xf32>
      tpu.vector_store %arg10[%c0_63, %c0_64, %c0_65], %138 {strides = array<i32>} : memref<1x8x128xf32, #tpu.memory_space<vmem>>, vector<1x8x128xf32>,
    } else {
    }
    return
  }
  func.func @transform_0(%arg0: i32, %arg1: i32) -> (i32, i32, i32, i32) {
    %c0_i32 = arith.constant 0 : i32
    %c0_i32_0 = arith.constant 0 : i32
    %c0_i32_1 = arith.constant 0 : i32
    %c0_i32_2 = arith.constant 0 : i32
    return %arg0, %c0_i32, %c0_i32_0, %c0_i32_1 : i32, i32, i32, i32
  }
  func.func @transform_1(%arg0: i32, %arg1: i32) -> (i32, i32) {
    %c0_i32 = arith.constant 0 : i32
    %c0_i32_0 = arith.constant 0 : i32
    return %arg1, %c0_i32 : i32, i32
  }
  func.func @transform_2(%arg0: i32, %arg1: i32) -> (i32, i32) {
    %c0_i32 = arith.constant 0 : i32
    %c0_i32_0 = arith.constant 0 : i32
    %c0_i32_1 = arith.constant 0 : i32
    return %c0_i32, %c0_i32_0 : i32, i32
  }
  func.func @transform_3(%arg0: i32, %arg1: i32) -> (i32, i32) {
    %c0_i32 = arith.constant 0 : i32
    %c0_i32_0 = arith.constant 0 : i32
    %c0_i32_1 = arith.constant 0 : i32
    return %c0_i32, %c0_i32_0 : i32, i32
  }
  func.func @transform_4(%arg0: i32, %arg1: i32) -> (i32, i32, i32) {
    %c0_i32 = arith.constant 0 : i32
    %c0_i32_0 = arith.constant 0 : i32
    return %arg0, %arg1, %c0_i32 : i32, i32, i32
  }
  func.func @transform_5(%arg0: i32, %arg1: i32) -> (i32, i32, i32) {
    %c0_i32 = arith.constant 0 : i32
    %c0_i32_0 = arith.constant 0 : i32
    return %arg0, %arg1, %c0_i32 : i32, i32, i32
  }
  func.func @transform_6(%arg0: i32, %arg1: i32) -> (i32, i32, i32) {
    %c0_i32 = arith.constant 0 : i32
    %c0_i32_0 = arith.constant 0 : i32
    return %arg0, %arg1, %c0_i32 : i32, i32, i32
  }
  func.func @transform_7(%arg0: i32, %arg1: i32) -> (i32, i32, i32) {
    %c0_i32 = arith.constant 0 : i32
    %c0_i32_0 = arith.constant 0 : i32
    return %arg0, %arg1, %c0_i32 : i32, i32, i32
  }
  func.func @transform_8(%arg0: i32, %arg1: i32) -> (i32, i32, i32) {
    %c0_i32 = arith.constant 0 : i32
    %c0_i32_0 = arith.constant 0 : i32
    %c0_i32_1 = arith.constant 0 : i32
    return %arg0, %c0_i32, %c0_i32_0 : i32, i32, i32
  }
}

</mosaic_0001>

<bundles_post_ra>
// kernel: db_loss.1
= control target key start
LH: loop header
LB: loop body
LE: loop exit
PB: predicated region body
PF: predicated region fallthrough
CT: control target
= control target key end

     0   :  { %s2114_s0 = inlined_call_operand.vmem [shape: f32[2,3,8,8], index: 0, kind: input, shape index: {}]   ;;  %s2115_s1 = inlined_call_operand.vmem [shape: f32[16,8], index: 1, kind: input, shape index: {}, may-alias: {1,3}]   ;;  %s2116_s2 = inlined_call_operand.vmem [shape: f32[8,16], index: 2, kind: input, shape index: {}]   ;;  %s2117_s3 = inlined_call_operand.vmem [shape: f32[16,8], index: 3, kind: input, shape index: {}, may-alias: {1,3}]   ;;  %s2118_s4 = inlined_call_operand.hbm [shape: f32[2,16,16], index: 4, kind: input, shape index: {}]   ;;  %s2119_s5 = inlined_call_operand.hbm [shape: f32[2,16,16], index: 5, kind: input, shape index: {}]   ;;  %s2120_s6 = inlined_call_operand.hbm [shape: f32[2,16,16], index: 6, kind: input, shape index: {}]   ;;  %s2121_s7 = inlined_call_operand.hbm [shape: f32[2,16,16], index: 7, kind: input, shape index: {}]   ;;  %s2122_s8 = inlined_call_operand.vmem [shape: f32[2,8,128], index: 8, kind: output, shape index: {}]  }
   0x1   :  { %2133 = sst [smem:[#allocation21_spill]] %s2117_s3 }
   0x2   :  { %2134 = sst [smem:[#allocation22_spill]] %s2119_s5 }
   0x3   :  { %13 = vsyncpa [#allocation6], 0 }
   0x4   :  { %15 = vsyncpa [#allocation6 + $0x1], 0 }
   0x5   :  { %16 = vsyncpa [#allocation8], 0 }
   0x6   :  { %18 = vsyncpa [#allocation8 + $0x1], 0 }
   0x7   :  { %19 = vsyncpa [#allocation11], 0 }
   0x8   :  { %21 = vsyncpa [#allocation11 + $0x1], 0  ;;  %s1777_s27 = smov 0   ;;  %s1779_s28 = smov 0  }
   0x9   :  { %s1781_s29 = smov 0   ;;  %s1783_s30 = smov 0  }
   0xa   :  { %s1785_s9 = smov 0   ;;  %s1787_s10 = smov 0  }
   0xb   :  { %s1789_s11 = smov 0   ;;  %s1791_s12 = smov 0  }
   0xc LB: > { %2135 = sst [smem:[#allocation15_spill]] %s1699_s29  ;;  %s2123_s13 = sadd.s32 4294967295, %s1719_s12   ;;  %s1719_s12 = sphi %s1791_s12, %s27_s12   ;;  %s1715_s11 = sphi %s1789_s11, %s2159_s11   ;;  %s1711_s10 = sphi %s1787_s10, %s2158_s10   ;;  %s1707_s9 = sphi %s1785_s9, %s2157_s9   ;;  %s1703_s30 = sphi %s1783_s30, %s2156_s30   ;;  %s1699_s29 = sphi %s1781_s29, %s2155_s29   ;;  %s1695_s28 = sphi %s1779_s28, %s2161_s28   ;;  %s1691_s27 = sphi %s1777_s27, %s2160_s27  }
   0xd   : > { %2136 = sst [smem:[#allocation16_spill]] %s1711_s10  ;;  %s36_s14 = sadd.s32 1, %s1711_s10 }
   0xe   : > { %2137 = sst [smem:[#allocation17_spill]] %s1715_s11  ;;  %p37_p0 = scmp.ge.s32.totalorder %s36_s14, 2 }
   0xf   : > { %s39_s15 = sadd.s32 1, %s1715_s11  ;;  %s142_s16 = sadd.s32 1, %s1699_s29 }
  0x10   : > { %p149_p1 = scmp.ne.s32.totalorder %s1699_s29, %s1695_s28  ;;  %s2163_s14 = smov (%p37_p0, %s36_s14), 0 }
  0x11   : > { %2138 = sst [smem:[#allocation18_spill]] %s2163_s14  ;;  %s2165_s15 = smov (!%p37_p0, %s39_s15), %s1715_s11 }
  0x12   : > { %s138_s17 = ssub.s32 %s1711_s10, %s2163_s14  ;;  %p150_p2 = scmp.eq.s32.totalorder %s1719_s12, 0 }
  0x13   : > { %p41_p3 = scmp.ge.s32.totalorder %s2165_s15, 2  ;;  %p155_p4 = scmp.ne.s32.totalorder %s1695_s28, %s1691_s27 }
  0x14   : > { %p151_p5 = por %p150_p2, %p149_p1  ;;  %p156_p6 = scmp.eq.s32.totalorder %s2123_s13, 0 }
  0x15   : > { %s2167_s15 = smov (%p41_p3, %s2165_s15), 0  ;;  %p1453_p8 = scmp.lt.s32.totalorder %s1719_s12, 4 }
  0x16   : > { %2139 = sst [smem:[#allocation19_spill]] %s2167_s15  ;;  %p1832_p7 = por %p156_p6, %p155_p4 }
  0x17   : > { %s137_s19 = ssub.s32 %s1715_s11, %s2167_s15  ;;  %s1840_s21 = sand.u32 1, %s1699_s29  }
  0x18   : > { %s2140_s18 = scalar_select %p1832_p7, 1, 0 }
  0x19   : > { %s139_s20 = sor.u32 %s138_s17, %s137_s19  ;;  %s1843_s22 = sshll.u32 %s1840_s21, 3 }
  0x1a   : > { %p140_p9 = scmp.eq.s32.totalorder %s139_s20, 0  ;;  %s1322_s23 = sshll.u32 %s1715_s11, 1 }
  0x1b   : > { %p1846_p10 = pnand %p1453_p8, %p151_p5  ;;  %s319_s26 = sadd.s32 %s1711_s10, %s1322_s23 }
  0x1c   : > { %s1851_s25 = scalar_select %p140_p9, %s1699_s29, %s142_s16  }
  0x1d   : > { %s2141_s24 = scalar_select %p1846_p10, 1, 0 }
  0x1e   : > { %2142 = sst [smem:[#allocation20_spill]] %s1851_s25  ;;  %s1854_s27 = sshll.u32 %s319_s26, 7 }
  0x1f   : > { %s330_s17 = sand.u32 1, %s1719_s12   ;;  %s2143_s5 = sld [smem:[#allocation22_spill]] }
  0x20   : > { %s334_s15 = scalar_lea.vmem [#allocation7], %s1843_s22  ;;  %s1867_s16 = scalar_lea.sflag [#allocation8], %s330_s17 }
  0x21   : > { %s343_s14 = sshll.u32 %s334_s15, 4  ;;  %p1873_p13 = pneg %p1846_p10  ;;  %s1864_s14 = int_to_ptr.vmem [resolvable:$true] %s343_s14 }
  0x25   : > { %s1861_s20 = scalar_lea.hbm %s2143_s5, %s1854_s27  ;;  %s1530_s15 = scalar_lea.hbm %s2143_s5, 512 }
  0x26   : > { %s1525_s23 = scalar_lea.hbm %s1861_s20, 128  ;;  %p1531_p2 = scmp.lt.u32.totalorder %s1861_s20, %s2143_s5 }
  0x27   : > { %p1526_p12 = scmp.ne.s32.totalorder %s1861_s20, %s1525_s23  ;;  %p1532_p3 = scmp.lt.u32.totalorder %s1530_s15, %s1525_s23 }
  0x28   : > { %p1534_p5 = scmp.lt.u32.totalorder %s1525_s23, %s1861_s20 }
  0x29   : > { %p1528_p0 = pnand %p1873_p13, %p1526_p12  ;;  %p1533_p4 = por %p1532_p3, %p1531_p2 }
  0x2b   : > { %p1529_p1 = pneg %p1528_p0  ;;  %p1535_p6 = por %p1534_p5, %p1533_p4 }
  0x2d   : > { %p1536_p8 = pnand %p1535_p6, %p1529_p1 }
  0x2f   : > { %1539 = shalt.err (!%p1536_p8)
}
  0x30   : > { %s1540_s17 = scalar_lea.vmem %s1864_s14, 128  ;;  %s1721_s13 = smov [#allocation7]  }
  0x31   : > { %p1541_p9 = scmp.ne.s32.totalorder %s1864_s14, %s1540_s17  ;;  %s1545_s19 = sshll.u32 %s1721_s13, 4  ;;  %s1546_s19 = int_to_ptr.vmem [resolvable:$false] %s1545_s19 }
  0x32   : > { %s1547_s10 = scalar_lea.vmem %s1546_s19, 256  ;;  %p1548_p11 = scmp.lt.s32.totalorder %s1864_s14, %s1546_s19 }
  0x33   : > { %p1543_p12 = pnand %p1541_p9, %p1873_p13  ;;  %p1549_p7 = scmp.lt.s32.totalorder %s1547_s10, %s1540_s17 }
  0x35   : > { %p1544_p0 = pneg %p1543_p12  ;;  %p1550_p2 = por %p1549_p7, %p1548_p11 }
  0x37   : > { %p1551_p3 = pnand %p1550_p2, %p1544_p0 }
  0x39   : > { %1554 = shalt.err (!%p1551_p3)
}
  0x3a   : > { %1446 = dma.hbm_to_vmem [thread:$0]  (!%p1846_p10), %s1861_s20, 128, %s1864_s14, %s1867_s16  }
  0x3b   : > { %p388_p1 = scmp.lt.s32.totalorder %s1719_s12, 5  ;;  %p2145_p4 = scmp.ge.s32.totalorder %s1719_s12, 1 }
  0x3c   : > { %s1908_s17 = scalar_lea.hbm %s2118_s4, %s1854_s27  ;;  %s314_s13 = scalar_lea.vmem [#allocation5], %s1843_s22 }
  0x3d   : > { %p1900_p5 = pnand %p2145_p4, %p388_p1  ;;  %s323_s19 = sshll.u32 %s314_s13, 4  ;;  %s324_s19 = int_to_ptr.vmem [resolvable:$true] %s323_s19 }
  0x3e   : > { %s311_s10 = scalar_lea.sflag [#allocation6], %s1840_s21  ;;  %s1555_s14 = scalar_lea.hbm %s1908_s17, 128 }
  0x3f   : > { %s2146_s11 = scalar_select %p1900_p5, 1, 0 }
  0x40   : > { %p1556_p7 = scmp.ne.s32.totalorder %s1908_s17, %s1555_s14  ;;  %s1560_s25 = scalar_lea.hbm %s2118_s4, 512 }
  0x41   : > { %p1561_p8 = scmp.lt.u32.totalorder %s1908_s17, %s2118_s4  ;;  %p1562_p9 = scmp.lt.u32.totalorder %s1560_s25, %s1555_s14 }
  0x42   : > { %p1558_p11 = pnand %p1556_p7, %p1873_p13  ;;  %p1564_p0 = scmp.lt.u32.totalorder %s1555_s14, %s1908_s17 }
  0x43   : > { %p1563_p12 = por %p1562_p9, %p1561_p8 }
  0x44   : > { %p1559_p6 = pneg %p1558_p11 }
  0x45   : > { %p1565_p2 = por %p1564_p0, %p1563_p12 }
  0x47   : > { %p1566_p3 = pnand %p1565_p2, %p1559_p6 }
  0x49   : > { %1569 = shalt.err (!%p1566_p3)
}
  0x4a   : > { %s1570_s13 = scalar_lea.vmem %s324_s19, 128  ;;  %s1722_s29 = smov [#allocation5]  }
  0x4b   : > { %p1571_p1 = scmp.ne.s32.totalorder %s324_s19, %s1570_s13  ;;  %s1575_s3 = sshll.u32 %s1722_s29, 4  ;;  %s1576_s3 = int_to_ptr.vmem [resolvable:$false] %s1575_s3 }
  0x4c   : > { %s1577_s5 = scalar_lea.vmem %s1576_s3, 256  ;;  %p1578_p11 = scmp.lt.s32.totalorder %s324_s19, %s1576_s3 }
  0x4d   : > { %p1573_p4 = pnand %p1571_p1, %p1873_p13  ;;  %p1579_p5 = scmp.lt.s32.totalorder %s1577_s5, %s1570_s13 }
  0x4f   : > { %p1574_p7 = pneg %p1573_p4  ;;  %p1580_p10 = por %p1579_p5, %p1578_p11 }
  0x51   : > { %p1581_p8 = pnand %p1580_p10, %p1574_p7 }
  0x53   : > { %1584 = shalt.err (!%p1581_p8)
}
  0x54   : > { %p2147_p9 = scmp.ne.s32.totalorder %s2141_s24, 0  ;;  %s1933_s20 = scalar_lea.hbm %s2120_s6, %s1854_s27 }
  0x55   : > { %s354_s3 = scalar_lea.vmem [#allocation9], %s1843_s22  ;;  %s1585_s23 = scalar_lea.hbm %s1933_s20, 128 }
  0x56   : > { %1443 = dma.hbm_to_vmem [thread:$0]  (!%p2147_p9), %s1908_s17, 128, %s324_s19, %s311_s10  }
  0x57   : > { %s363_s29 = sshll.u32 %s354_s3, 4  ;;  %p1586_p10 = scmp.ne.s32.totalorder %s1933_s20, %s1585_s23  ;;  %s364_s29 = int_to_ptr.vmem [resolvable:$true] %s363_s29 }
  0x58   : > { %s1590_s17 = scalar_lea.hbm %s2120_s6, 512  ;;  %p1591_p12 = scmp.lt.u32.totalorder %s1933_s20, %s2120_s6 }
  0x59   : > { %p1588_p5 = pnand %p1586_p10, %p1873_p13  ;;  %p1592_p0 = scmp.lt.u32.totalorder %s1590_s17, %s1585_s23 }
  0x5a   : > { %p1594_p3 = scmp.lt.u32.totalorder %s1585_s23, %s1933_s20 }
  0x5b   : > { %p1589_p6 = pneg %p1588_p5  ;;  %p1593_p2 = por %p1592_p0, %p1591_p12 }
  0x5d   : > { %p1595_p1 = por %p1594_p3, %p1593_p2 }
  0x5f   : > { %p1596_p4 = pnand %p1595_p1, %p1589_p6 }
  0x61   : > { %1599 = shalt.err (!%p1596_p4)
}
  0x62   : > { %s1600_s5 = scalar_lea.vmem %s364_s29, 128  ;;  %s1723_s25 = smov [#allocation9]  }
  0x63   : > { %p1601_p7 = scmp.ne.s32.totalorder %s364_s29, %s1600_s5  ;;  %s1605_s14 = sshll.u32 %s1723_s25, 4  ;;  %s1606_s14 = int_to_ptr.vmem [resolvable:$false] %s1605_s14 }
  0x64   : > { %s1607_s3 = scalar_lea.vmem %s1606_s14, 256  ;;  %p1608_p10 = scmp.lt.s32.totalorder %s364_s29, %s1606_s14 }
  0x65   : > { %p1603_p11 = pnand %p1601_p7, %p1873_p13  ;;  %p1609_p5 = scmp.lt.s32.totalorder %s1607_s3, %s1600_s5 }
  0x67   : > { %p1604_p8 = pneg %p1603_p11  ;;  %p1610_p9 = por %p1609_p5, %p1608_p10 }
  0x69   : > { %p1611_p0 = pnand %p1610_p9, %p1604_p8 }
  0x6b   : > { %1614 = shalt.err (!%p1611_p0)
}
  0x6c   : > { %p2148_p12 = scmp.ne.s32.totalorder %s2141_s24, 0  ;;  %s1958_s13 = scalar_lea.hbm %s2121_s7, %s1854_s27 }
  0x6d   : > { %s374_s17 = scalar_lea.vmem [#allocation10], %s1843_s22  ;;  %s371_s10 = scalar_lea.sflag [#allocation11], %s1840_s21 }
  0x6e   : > { %1449 = dma.hbm_to_vmem [thread:$0]  (!%p2148_p12), %s1933_s20, 128, %s364_s29, %s1867_s16  }
  0x6f   : > { %s383_s19 = sshll.u32 %s374_s17, 4  ;;  %s1615_s5 = scalar_lea.hbm %s1958_s13, 128  ;;  %s384_s19 = int_to_ptr.vmem [resolvable:$true] %s383_s19 }
  0x70   : > { %p1616_p9 = scmp.ne.s32.totalorder %s1958_s13, %s1615_s5  ;;  %s1620_s20 = scalar_lea.hbm %s2121_s7, 512 }
  0x71   : > { %p1621_p3 = scmp.lt.u32.totalorder %s1958_s13, %s2121_s7  ;;  %p1622_p1 = scmp.lt.u32.totalorder %s1620_s20, %s1615_s5 }
  0x72   : > { %p1618_p6 = pnand %p1616_p9, %p1873_p13  ;;  %p1624_p7 = scmp.lt.u32.totalorder %s1615_s5, %s1958_s13 }
  0x73   : > { %p1623_p4 = por %p1622_p1, %p1621_p3 }
  0x74   : > { %p1619_p2 = pneg %p1618_p6 }
  0x75   : > { %p1625_p11 = por %p1624_p7, %p1623_p4 }
  0x77   : > { %p1626_p8 = pnand %p1625_p11, %p1619_p2 }
  0x79   : > { %1629 = shalt.err (!%p1626_p8)
}
  0x7a   : > { %s1630_s21 = scalar_lea.vmem %s384_s19, 128  ;;  %s1724_s22 = smov [#allocation10]  }
  0x7b   : > { %p1631_p10 = scmp.ne.s32.totalorder %s384_s19, %s1630_s21  ;;  %s1635_s14 = sshll.u32 %s1724_s22, 4  ;;  %s1636_s14 = int_to_ptr.vmem [resolvable:$false] %s1635_s14 }
  0x7c   : > { %s1637_s3 = scalar_lea.vmem %s1636_s14, 256  ;;  %p1638_p9 = scmp.lt.s32.totalorder %s384_s19, %s1636_s14 }
  0x7d   : > { %p1633_p5 = pnand %p1631_p10, %p1873_p13  ;;  %p1639_p6 = scmp.lt.s32.totalorder %s1637_s3, %s1630_s21 }
  0x7f   : > { %p1634_p0 = pneg %p1633_p5  ;;  %p1640_p12 = por %p1639_p6, %p1638_p9 }
  0x81   : > { %p1641_p1 = pnand %p1640_p12, %p1634_p0 }
  0x83   : > { %1644 = shalt.err (!%p1641_p1)
}
  0x84   : > { %p2149_p3 = scmp.ne.s32.totalorder %s2141_s24, 0  ;;  %p2150_p2 = scmp.ne.s32.totalorder %s2146_s11, 0 }
  0x85   : > { %s394_s26 = sand.u32 (!%p2150_p2), 1, %s1695_s28   ;;  %p2151_p13 = scmp.ne.s32.totalorder (!%p2150_p2), %s2140_s18, 0 }
  0x86   : > { %1452 = dma.hbm_to_vmem [thread:$0]  (!%p2149_p3), %s1958_s13, 128, %s384_s19, %s371_s10  }
  0x87   : > { %392 = sbr.rel (%p2150_p2) target bundleno = 1157 (0x485), region = 52  ;;  %s1982_s23 = sshll.u32 (!%p2150_p2), %s394_s26, 3 }
  0x88   : > { %s395_s15 = scalar_lea.sflag (!%p2150_p2), [#allocation6], %s394_s26  ;;  %s398_s17 = scalar_lea.vmem (!%p2150_p2), [#allocation5], %s1982_s23 }
  0x8e   : > { %1678 = dma.done.wait (%p2151_p13), %s395_s15, 128  }
  0x8f   : > { %1680 = vsyncadd (%p2151_p13), %s395_s15, 4294967168  ;;  %s2152_s24 = sadd.s32 4294967295, %s1719_s12   ;;  %s407_s19 = scalar_lea.vmem [#allocation7], %s1982_s23 }
  0x90   : > { %s403_s13 = sand.u32 1, %s2152_s24  }
  0x91   : > { %s404_s11 = scalar_lea.sflag [#allocation8], %s403_s13 }
  0x92   : > { %1682 = dma.done.wait (%p2151_p13), %s404_s11, 256  }
  0x93   : > { %1684 = vsyncadd (%p2151_p13), %s404_s11, 4294967040  ;;  %s416_s10 = scalar_lea.vmem [#allocation9], %s1982_s23  ;;  %s422_s5 = scalar_lea.sflag [#allocation11], %s394_s26 }
  0x94   : > { %s425_s25 = scalar_lea.vmem [#allocation10], %s1982_s23 }
  0x95   : > { %1686 = dma.done.wait (%p2151_p13), %s422_s5, 128  }
  0x96   : > { %1688 = vsyncadd (%p2151_p13), %s422_s5, 4294967168  ;;  %p486_p12 = scmp.lt.s32.totalorder %s1703_s30, 1  ;;  %p481_p4 = scmp.lt.s32.totalorder %s1707_s9, 1 }
  0x97   : > { %p1341_p7 = scmp.ne.s32.totalorder %s1703_s30, 0 }
  0x98   : > { %s487_s16 = scalar_select %p486_p12, %s1703_s30, 1 }
  0x99   : > { %s2169_s9 = smov (!%p481_p4, %s1707_s9), 1  ;;  %498 = sbr.rel (%p1341_p7) target bundleno = 371 (0x173), region = 72 }
  0x9a   : > { %s1339_s20 = sshll.u32 %s487_s16, 3  ;;  %s1415_s22 = smul.u32 24, %s2169_s9  ;;  %v505_v1 = vld [vmem:[%s2116_s2] sm:$0xff] (!%p1341_p7)  ;;  %vm506_vm0 = vcmask (!%p1341_p7), 64512   ;;  %vm500_vm1 = vcmask (!%p1341_p7), 130048   ;;  %v1725_v3 = vmov (!%p1341_p7), 0.0  }
  0x9b   : > { %s489_s21 = scalar_lea.vmem %s2115_s1, %s1339_s20  ;;  %s1340_s14 = sshll.u32 %s2169_s9, 3  ;;  %1375 = vmatprep.subr.mxu0 (!%p1341_p7), %v1725_v3  ;;  %vm1726_vm2 = vmmov (!%p1341_p7), 0   ;;  %501 = vst.msk [vmem:[#allocation3] sm:$0xff] (!%p1341_p7), %vm500_vm1, %v1725_v3  ;;  %502 = vst.msk [vmem:[#allocation4] sm:$0xff] (!%p1341_p7), %vm500_vm1, %v1725_v3 }
  0x9c   : > { %v494_v0 = vld [vmem:[%s489_s21] sm:$0xff]  ;;  %s2012_s18 = scalar_lea.vmem %s2114_s0, %s1415_s22  ;;  %s2017_s13 = scalar_lea.vmem %s2122_s8, %s1340_s14  ;;  %1377 = vmatprep.mubr.msk.f32.mxu0 (!%p1341_p7), %vm1726_vm2, %v1725_v3  ;;  %1376 = vmatpush3.msra.mxu0 (!%p1341_p7), %v505_v1 }
  0x9d   : > { %v1342_v2 = vld [vmem:[%s2012_s18 + $0x8] sm:$0xff] (!%p1341_p7)  ;;  %499 = vst [vmem:[%s2017_s13] sm:$0xff] (!%p1341_p7), %v1725_v3 }
  0x9e   : > { %1378 = vmatmul.mubr.msk.f32.vlgmr.msra.gmra.mrb[0].mxu0 (!%p1341_p7), %vm506_vm0, %v1342_v2 }
 0x171   : > { %v576_v4 = vpop.f32.mrb[0].mxu0 }
 0x172   : > { %580 = vst.msk [vmem:[#allocation2] sm:$0xff] %vm500_vm1, %v576_v4  ;;  %v1379_v5 = vpop.f32.mrb[1].mxu0 }
 0x173 PF: > { %vm587_vm3 = vcmask 64512   ;;  %705 = vxpose.xlu0.b32.start.end [1/1] (short) (narrow) %v494_v0, 8  ;;  %v582_v7 = vld [vmem:[%s407_s19] sm:$0xff]  ;;  %v1727_v8 = vmov 0.0   ;;  %vm1728_vm4 = vmmov 0   ;;  %vm664_vm5 = vcmask 130048  }
 0x174   : > { %1380 = vmatprep.subr.mxu0 %v1727_v8  ;;  %1382 = vmatprep.mubr.msk.f32.mxu0 %vm1728_vm4, %v1727_v8  ;;  %v583_v9 = vld [vmem:[%s416_s10] sm:$0xff]  ;;  %v584_v10 = vld [vmem:[%s425_s25] sm:$0xff]  ;;  %v675_v11 = vsel %vm664_vm5, %v582_v7, 0.0  ;;  %v886_v59 = vlaneseq  ;;  %p1351_p11 = scmp.ne.s32.totalorder %s1703_s30, 1 }
 0x175   : > { %v585_v12 = vmul.f32 %v584_v10, %v583_v9  ;;  %1385 = vmatprep.subr.mxu1 %v1727_v8  ;;  %676 = vadd.xlane.f32.xlu1 %v675_v11  ;;  %v695_v14 = vsel %vm664_vm5, %v584_v10, 0.0  ;;  %v581_v16 = vld [vmem:[%s398_s17] sm:$0xff]  ;;  %v737_v23 = vld [vmem:[#allocation3] sm:$0xff]  ;;  %v813_v24 = vld [vmem:[#allocation4] sm:$0xff]  ;;  %s2153_s16 = sld [smem:[#allocation21_spill]] (!%p1351_p11)  ;;  %vm1730_vm10 = vmmov (!%p1351_p11), 0  }
 0x176   : > { %1387 = vmatprep.mubr.msk.f32.mxu1 %vm1728_vm4, %v1727_v8  ;;  %v2051_v60 = vand.u32 127, %v886_v59 }
 0x177   : > { %v685_v13 = vsel %vm664_vm5, %v585_v12, 0.0  ;;  %1386 = vmatpush3.msra.mxu1 %v585_v12  ;;  %v888_v12 = vld [vmem:[%s2017_s13] sm:$0xff] }
 0x178   : > { %vm889_vm6 = vcmp.eq.s32.totalorder %v2051_v60, 2  ;;  %vm895_vm7 = vcmp.eq.s32.totalorder %v2051_v60, 3  ;;  %vm901_vm8 = vcmp.eq.s32.totalorder %v2051_v60, 4  ;;  %vm907_vm9 = vcmp.eq.s32.totalorder %v2051_v60, 5 }
 0x179   : > { %v586_v6 = vld [vmem:[#allocation2] sm:$0xff]  ;;  %686 = vadd.xlane.f32.xlu1 %v685_v13  ;;  %v1347_v61 = vsel %vm889_vm6, 1.0, %v1727_v8  ;;  %v1348_v62 = vsel %vm895_vm7, 1.0, %v1727_v8  ;;  %v1350_v5 = vsel %vm907_vm9, 1.0, %v1727_v8  ;;  %vm1117_vm11 = vcmp.eq.s32.totalorder (!%p1351_p11), %v2051_v60, 0 }
 0x17a   : > { %1381 = vmatpush3.msra.mxu0 %v586_v6  ;;  %vm1123_vm12 = vcmp.eq.s32.totalorder (!%p1351_p11), %v2051_v60, 1  ;;  %vm1129_vm13 = vcmp.eq.s32.totalorder (!%p1351_p11), %v2051_v60, 6  ;;  %vm1135_vm14 = vcmp.eq.s32.totalorder (!%p1351_p11), %v2051_v60, 7 }
 0x17b   : > { %1383 = vmatmul.mubr.msk.f32.vlgmr.msra.gmra.mrb[0].mxu0 %vm587_vm3, %v494_v0  ;;  %1390 = vmatprep.subr.mxu0 %v1727_v8  ;;  %v1349_v0 = vsel %vm901_vm8, 1.0, %v1727_v8 }
 0x17c   : > { %1391 = vmatpush3.msra.mxu0 %v584_v10  ;;  %1392 = vmatprep.mubr.msk.f32.mxu0 %vm1728_vm4, %v1727_v8  ;;  %v920_v8 = vld [vmem:[%s2153_s16 + $0x8] sm:$0xff] (!%p1351_p11) }
 0x17d   : > { %696 = vadd.xlane.f32.xlu1 %v695_v14 }
 0x1f3   : > { %v721_v15 = vpop.trf.xlu0 }
 0x1f4   : > { %1388 = vmatmul.mubr.msk.f32.vlgmr.msra.gmra.mrb[0].mxu1 %vm587_vm3, %v721_v15  ;;  %1393 = vmatmul.mubr.msk.f32.vlgmr.msra.gmra.mrb[2].mxu0 %vm587_vm3, %v721_v15  ;;  %v919_v15 = vld [vmem:[%s2153_s16] sm:$0xff] (!%p1351_p11) }
 0x202   : > { %v677_v31 = vpop.xlane.xlu1 %676 }
 0x203   : > { %v678_v34 = vrot.slane %v677_v31, 4 }
 0x205   : > { %v679_v37 = vadd.f32 %v678_v34, %v677_v31 }
 0x206   : > { %v687_v32 = vpop.xlane.xlu1 %686 }
 0x207   : > { %v688_v35 = vrot.slane %v687_v32, 4  ;;  %v680_v40 = vrot.slane %v679_v37, 2 }
 0x209   : > { %v689_v38 = vadd.f32 %v688_v35, %v687_v32  ;;  %v681_v46 = vadd.f32 %v680_v40, %v679_v37 }
 0x20a   : > { %v697_v33 = vpop.xlane.xlu1 %696 }
 0x20b   : > { %v698_v36 = vrot.slane %v697_v33, 4  ;;  %v690_v42 = vrot.slane %v689_v38, 2  ;;  %v682_v51 = vrot.slane %v681_v46, 1 }
 0x20d   : > { %v699_v39 = vadd.f32 %v698_v36, %v697_v33  ;;  %v691_v48 = vadd.f32 %v690_v42, %v689_v38  ;;  %v683_v56 = vadd.f32 %v682_v51, %v681_v46 }
 0x20f   : > { %v700_v44 = vrot.slane %v699_v39, 2  ;;  %v692_v53 = vrot.slane %v691_v48, 1 }
 0x211   : > { %v701_v49 = vadd.f32 %v700_v44, %v699_v39  ;;  %v693_v57 = vadd.f32 %v692_v53, %v691_v48 }
 0x213   : > { %v702_v54 = vrot.slane %v701_v49, 1 }
 0x215   : > { %v703_v58 = vadd.f32 %v702_v54, %v701_v49 }
 0x24e   : > { %v657_v17 = vpop.f32.mrb[0].mxu0 }
 0x24f   : > { %v661_v18 = vsub.f32 %v657_v17, %v581_v16  ;;  %v1384_v19 = vpop.f32.mrb[1].mxu0  ;;  %v1729_v16 = vmov (!%p1351_p11), 0.0|0.0   ;;  %v1410_v17 = vpack.c.bf16 (!%p1351_p11), %v920_v8, %v919_v15 }
 0x250   : > { %1409 = vmatprep.subr.bf16.mxu0 (!%p1351_p11), %v1729_v16  ;;  %1412 = vmatprep.subr.bf16.mxu1 (!%p1351_p11), %v1729_v16 }
 0x251   : > { %v662_v20 = vand.u32 2147483647, %v661_v18  ;;  %v1731_v18 = vmov (!%p1351_p11), 0.0   ;;  %1411 = vmatpush3.bf16.msra.mxu0 (!%p1351_p11), %v1410_v17  ;;  %1414 = vmatpush3.bf16.msra.mxu1 (!%p1351_p11), %v1410_v17 }
 0x252   : > { %1399 = vmatprep.mubr.msk.f32.mxu0 (!%p1351_p11), %vm1730_vm10, %v1731_v18  ;;  %1406 = vmatprep.mubr.msk.f32.mxu1 (!%p1351_p11), %vm1730_vm10, %v1731_v18 }
 0x253   : > { %v663_v21 = vmul.f32 %v662_v20, %v582_v7 }
 0x255   : > { %v665_v22 = vsel %vm664_vm5, %v663_v21, 0.0  ;;  %v1354_v21 = vld [vmem:[%s2012_s18 + $0x10] sm:$0xff] (!%p1351_p11) }
 0x256   : > { %666 = vadd.xlane.f32.xlu0 %v665_v22  ;;  %v1069_v22 = vld [vmem:[%s2012_s18] sm:$0xff] (!%p1351_p11) }
 0x2c7   : > { %v807_v25 = vpop.f32.mrb[0].mxu1  ;;  %v880_v26 = vpop.f32.mrb[2].mxu0 }
 0x2c8   : > { %v811_v27 = vadd.f32 %v807_v25, %v737_v23  ;;  %v884_v28 = vadd.f32 %v880_v26, %v813_v24  ;;  %v1389_v29 = vpop.f32.mrb[1].mxu1  ;;  %v1394_v30 = vpop.f32.mrb[3].mxu0 }
 0x2ca   : > { %812 = vst.msk [vmem:[#allocation3] sm:$0xff] %vm664_vm5, %v811_v27  ;;  %885 = vst.msk [vmem:[#allocation4] sm:$0xff] %vm664_vm5, %v884_v28 }
 0x2d1   : > { %v921_v19 = vld [vmem:[#allocation3] sm:$0xff] (!%p1351_p11)  ;;  %v995_v20 = vld [vmem:[#allocation4] sm:$0xff] (!%p1351_p11) }
 0x2d2   : > { %1400 = vmatmul.mubr.msk.f32.vlgmr.msra.gmra.mrb[0].mxu0 (!%p1351_p11), %vm664_vm5, %v921_v19  ;;  %1407 = vmatmul.mubr.msk.f32.vlgmr.msra.gmra.mrb[0].mxu1 (!%p1351_p11), %vm664_vm5, %v995_v20 }
 0x2e3   : > { %v667_v41 = vpop.xlane.xlu0 %666 }
 0x2e4   : > { %v668_v43 = vrot.slane %v667_v41, 4 }
 0x2e6   : > { %v669_v45 = vadd.f32 %v668_v43, %v667_v41 }
 0x2e8   : > { %v670_v47 = vrot.slane %v669_v45, 2 }
 0x2ea   : > { %v671_v50 = vadd.f32 %v670_v47, %v669_v45 }
 0x2ec   : > { %v672_v52 = vrot.slane %v671_v50, 1 }
 0x2ee   : > { %v673_v55 = vadd.f32 %v672_v52, %v671_v50 }
 0x2f0   : > { %1416 = vpush %v673_v55 }
 0x2f1   : > { %1418 = vpush %v683_v56 }
 0x2f2   : > { %1420 = vpush %v693_v57 }
 0x2f3   : > { %1422 = vpush %v703_v58 }
 0x321   : > { %s1417_s9 = spop %1416 }
 0x322   : > { %s1419_s23 = spop %1418  ;;  %v904_v1 = vstv %s1417_s9 }
 0x323   : > { %s1421_s17 = spop %1420  ;;  %v910_v6 = vstv %s1419_s23  ;;  %v905_v7 = vmul.f32 %v1349_v0, %v904_v1  ;;  %v1355_v0 = vsel (!%p1351_p11), %vm1117_vm11, 1.0, %v1731_v18 }
 0x324   : > { %v892_v63 = vstv %s1421_s17  ;;  %s1423_s19 = spop %1422  ;;  %v911_v10 = vmul.f32 %v1350_v5, %v910_v6 }
 0x325   : > { %v893_v2 = vmul.f32 %v1347_v61, %v892_v63  ;;  %v898_v3 = vstv %s1423_s19 }
 0x326   : > { %v899_v4 = vmul.f32 %v1348_v62, %v898_v3 }
 0x328   : > { %v900_v9 = vadd.f32 %v899_v4, %v893_v2  ;;  %v1356_v2 = vsel (!%p1351_p11), %vm1123_vm12, 1.0, %v1731_v18  ;;  %v1357_v4 = vsel (!%p1351_p11), %vm1129_vm13, 1.0, %v1731_v18 }
 0x32a   : > { %v906_v11 = vadd.f32 %v905_v7, %v900_v9  ;;  %918 = sbr.rel (%p1351_p11) target bundleno = 1157 (0x485), region = 76  ;;  %v1358_v9 = vsel (!%p1351_p11), %vm1135_vm14, 1.0, %v1731_v18 }
 0x32c   : > { %v912_v13 = vadd.f32 %v911_v10, %v906_v11 }
 0x32e   : > { %v913_v14 = vadd.f32 %v912_v13, %v888_v12 }
 0x330   : > { %914 = vst [vmem:[%s2017_s13] sm:$0xff] %v913_v14 }
 0x337   : > { %v1072_v15 = vld [vmem:[%s2017_s13] sm:$0xff] }
 0x3a5   : > { %v991_v23 = vpop.f32.mrb[0].mxu0  ;;  %v1065_v24 = vpop.f32.mrb[0].mxu1 }
 0x3a6   : > { %v1401_v25 = vpop.f32.mrb[1].mxu0  ;;  %v1408_v26 = vpop.f32.mrb[1].mxu1  ;;  %v1095_v27 = vmul.f32 %v1354_v21, %v991_v23  ;;  %v1073_v28 = vmul.f32 %v1069_v22, %v991_v23  ;;  %v1106_v29 = vmul.f32 %v1354_v21, %v1065_v24  ;;  %v1084_v30 = vmul.f32 %v1069_v22, %v1065_v24 }
 0x3a8   : > { %v1096_v31 = vsel %vm587_vm3, %v1095_v27, 0.0  ;;  %v1074_v32 = vsel %vm587_vm3, %v1073_v28, 0.0  ;;  %v1107_v33 = vsel %vm587_vm3, %v1106_v29, 0.0  ;;  %v1085_v34 = vsel %vm587_vm3, %v1084_v30, 0.0 }
 0x3a9   : > { %1097 = vadd.xlane.f32.xlu1 %v1096_v31  ;;  %1075 = vadd.xlane.f32.xlu0 %v1074_v32 }
 0x3ad   : > { %1108 = vadd.xlane.f32.xlu1 %v1107_v33  ;;  %1086 = vadd.xlane.f32.xlu0 %v1085_v34 }
 0x436   : > { %v1098_v35 = vpop.xlane.xlu1 %1097  ;;  %v1076_v36 = vpop.xlane.xlu0 %1075 }
 0x437   : > { %v1099_v37 = vrot.slane %v1098_v35, 4  ;;  %v1077_v38 = vrot.slane %v1076_v36, 4 }
 0x439   : > { %v1100_v39 = vadd.f32 %v1099_v37, %v1098_v35  ;;  %v1078_v40 = vadd.f32 %v1077_v38, %v1076_v36 }
 0x43a   : > { %v1109_v41 = vpop.xlane.xlu1 %1108  ;;  %v1087_v42 = vpop.xlane.xlu0 %1086 }
 0x43b   : > { %v1101_v43 = vrot.slane %v1100_v39, 2  ;;  %v1079_v44 = vrot.slane %v1078_v40, 2  ;;  %v1110_v45 = vrot.slane %v1109_v41, 4  ;;  %v1088_v46 = vrot.slane %v1087_v42, 4 }
 0x43d   : > { %v1111_v47 = vadd.f32 %v1110_v45, %v1109_v41  ;;  %v1089_v48 = vadd.f32 %v1088_v46, %v1087_v42  ;;  %v1080_v49 = vadd.f32 %v1079_v44, %v1078_v40  ;;  %v1102_v50 = vadd.f32 %v1101_v43, %v1100_v39 }
 0x43f   : > { %v1112_v51 = vrot.slane %v1111_v47, 2  ;;  %v1090_v52 = vrot.slane %v1089_v48, 2  ;;  %v1081_v53 = vrot.slane %v1080_v49, 1  ;;  %v1103_v57 = vrot.slane %v1102_v50, 1 }
 0x441   : > { %v1113_v54 = vadd.f32 %v1112_v51, %v1111_v47  ;;  %v1091_v55 = vadd.f32 %v1090_v52, %v1089_v48  ;;  %v1082_v56 = vadd.f32 %v1081_v53, %v1080_v49  ;;  %v1104_v63 = vadd.f32 %v1103_v57, %v1102_v50 }
 0x443   : > { %1424 = vpush %v1082_v56  ;;  %v1092_v58 = vrot.slane %v1091_v55, 1  ;;  %v1114_v59 = vrot.slane %v1113_v54, 1 }
 0x445   : > { %v1093_v61 = vadd.f32 %v1092_v58, %v1091_v55  ;;  %v1115_v62 = vadd.f32 %v1114_v59, %v1113_v54 }
 0x447   : > { %1426 = vpush %v1093_v61 }
 0x448   : > { %1428 = vpush %v1104_v63 }
 0x449   : > { %1430 = vpush %v1115_v62 }
 0x474   : > { %s1425_s30 = spop %1424 }
 0x475   : > { %v1120_v1 = vstv %s1425_s30 }
 0x476   : > { %v1121_v5 = vmul.f32 %v1355_v0, %v1120_v1 }
 0x478   : > { %s1427_s27 = spop %1426 }
 0x479   : > { %v1126_v3 = vstv %s1427_s27  ;;  %s1429_s21 = spop %1428 }
 0x47a   : > { %v1127_v6 = vmul.f32 %v1356_v2, %v1126_v3  ;;  %v1132_v7 = vstv %s1429_s21  ;;  %s1431_s22 = spop %1430 }
 0x47b   : > { %v1138_v10 = vstv %s1431_s22  ;;  %v1133_v12 = vmul.f32 %v1357_v4, %v1132_v7 }
 0x47c   : > { %v1128_v11 = vadd.f32 %v1127_v6, %v1121_v5  ;;  %v1139_v14 = vmul.f32 %v1358_v9, %v1138_v10 }
 0x47e   : > { %v1134_v13 = vadd.f32 %v1133_v12, %v1128_v11 }
 0x480   : > { %v1140_v8 = vadd.f32 %v1139_v14, %v1134_v13 }
 0x482   : > { %v1141_v16 = vadd.f32 %v1140_v8, %v1072_v15 }
 0x484   : > { %1142 = vst [vmem:[%s2017_s13] sm:$0xff] %v1141_v16 }
 0x485 PF: > { %s27_s12 = sadd.s32 1, %s1719_s12   ;;  %s2154_s14 = sld [smem:[#allocation15_spill]] }
 0x486   : > { %p24_p8 = scmp.ge.s32.totalorder %s27_s12, 6   ;;  %s2155_s29 = sld [smem:[#allocation20_spill]] }
 0x487   : > { %s2156_s30 = sld [smem:[#allocation16_spill]]  ;;  %s2157_s9 = sld [smem:[#allocation17_spill]] }
 0x488   : > { %s2158_s10 = sld [smem:[#allocation18_spill]]  ;;  %s2159_s11 = sld [smem:[#allocation19_spill]] }
 0x489   : > { %s2160_s27 = smov %s1695_s28  ;;  %26 = sbr.rel (!%p24_p8) target bundleno = 12 (0xc), region = 145 }
 0x48b   : > { %s2161_s28 = smov %s2154_s14 }
 0x490   :  { %1162 = vsyncpa [#allocation6], 1 }
 0x491   :  { %1164 = vsyncpa [#allocation6 + $0x1], 1 }
 0x492   :  { %1165 = vsyncpa [#allocation8], 1 }
 0x493   :  { %1167 = vsyncpa [#allocation8 + $0x1], 1 }
 0x494   :  { %1168 = vsyncpa [#allocation11], 1 }
 0x495   :  { %1170 = vsyncpa [#allocation11 + $0x1], 1 }

</bundles_post_ra>
